<compile_context>
chip_gen: v7x
topology: tpu7x:2x2x1
jax: 0.10.0
libtpu: 0.0.40
codegen_flags: <defaults>
</compile_context>

<pallas_src>
import jax
import jax.numpy as jnp
from jax.experimental import pallas as pl
from jax.experimental.pallas import tpu as pltpu


def _round_up(x, m):
    return (x + m - 1) // m * m


def _vmem_budget():
    """Generation-aware budget (bytes) for the double-buffered working set,
    plus an optional vmem_limit_bytes override for CompilerParams."""
    try:
        kind = jax.devices()[0].device_kind.lower()
    except Exception:  # pragma: no cover - defensive
        kind = ""
    if "v5 lite" in kind or "v5e" in kind:
        # 16 MiB scoped-VMEM default, lowest HBM BW: stay conservative, no override.
        return 12 << 20, None
    if "v6" in kind:
        # 128 MiB physical / 32 MiB scoped default: raise the limit, use big tiles.
        return 24 << 20, 28 << 20
    if "v7" in kind or "7x" in kind:
        # 64 MiB physical per TensorCore: bigger than v5e but leave headroom.
        return 20 << 20, 24 << 20
    # Unknown generation (v4, v5p, interpret mode, ...): conservative default.
    return 12 << 20, None


def _pick_tile_m(hw, nb, c_in, c_out, itemsize, budget, max_tile=16384):
    """Largest lane-aligned (multiple-of-128) spatial tile whose double-buffered
    x + out blocks (plus resident W/b buffers) stay under `budget`."""
    wb_bytes = 2 * (c_out * c_in + c_out) * itemsize      # W + b (double-buffered)
    avail = max(budget - wb_bytes, 1 << 20)
    per_lane = 2 * nb * (c_in + c_out) * itemsize          # dbl-buffered x + out
    tile = min(max_tile, _round_up(hw, 128))
    while tile > 128 and tile * per_lane > avail:
        tile = max(128, _round_up(tile // 2, 128))
    return tile


def _outconv_kernel(x_ref, w_ref, b_ref, o_ref):
    # x_ref: (NB, C_in, TM)   w_ref: (C_out, C_in)   b_ref: (C_out, 1)
    # o_ref: (NB, C_out, TM)  -- lane-dense output (TM is a multiple of 128).
    w = w_ref[...]
    b = b_ref[...].astype(jnp.float32)
    for n in range(x_ref.shape[0]):            # NB is static & small (1 or folded N)
        acc = jnp.dot(w, x_ref[n], preferred_element_type=jnp.float32)
        o_ref[n] = (acc + b).astype(o_ref.dtype)


@jax.jit
def outconv_forward(x_nchw, weight, bias):
    """1x1 Conv2d forward, matching nn.Conv2d(in, out, kernel_size=1).

    x_nchw : (N, C_in, H, W)
    weight : (C_out, C_in, 1, 1)   (PyTorch Conv2d layout)
    bias   : (C_out,)
    returns: (N, C_out, H, W) in x's dtype (f32 accumulation inside the kernel).
    """
    N, C_in, H, W = x_nchw.shape
    C_out = weight.shape[0]
    HW = H * W
    out_dtype = x_nchw.dtype
    itemsize = jnp.dtype(x_nchw.dtype).itemsize

    # Free reshapes — no layout transposes, no extra HBM passes.
    x = x_nchw.reshape(N, C_in, HW)
    w = weight.reshape(C_out, C_in)
    b = bias.reshape(C_out, 1)

    budget, vmem_limit = _vmem_budget()

    # Fold the whole batch into one block when doing so still allows large
    # (>= 1024-lane or full-image) spatial tiles: each DMA then moves N x more
    # bytes and the grid shrinks by N x, amortizing per-step overhead.
    tile_folded = _pick_tile_m(HW, N, C_in, C_out, itemsize, budget)
    fold_batch = (N <= 16) and tile_folded >= min(_round_up(HW, 128), 1024)

    if fold_batch:
        nb, tile_m = N, tile_folded
        grid = (pl.cdiv(HW, tile_m),)
        x_spec = pl.BlockSpec((nb, C_in, tile_m), lambda m: (0, 0, m))
        w_spec = pl.BlockSpec((C_out, C_in), lambda m: (0, 0))
        b_spec = pl.BlockSpec((C_out, 1), lambda m: (0, 0))
        o_spec = pl.BlockSpec((nb, C_out, tile_m), lambda m: (0, 0, m))
        dim_sem = ("parallel",)
    else:
        nb = 1
        tile_m = _pick_tile_m(HW, 1, C_in, C_out, itemsize, budget)
        grid = (N, pl.cdiv(HW, tile_m))
        x_spec = pl.BlockSpec((1, C_in, tile_m), lambda n, m: (n, 0, m))
        w_spec = pl.BlockSpec((C_out, C_in), lambda n, m: (0, 0))
        b_spec = pl.BlockSpec((C_out, 1), lambda n, m: (0, 0))
        o_spec = pl.BlockSpec((1, C_out, tile_m), lambda n, m: (n, 0, m))
        dim_sem = ("parallel", "parallel")

    flops = 2 * N * HW * C_in * C_out
    bytes_accessed = (
        N * C_in * HW * itemsize
        + C_out * C_in * jnp.dtype(w.dtype).itemsize
        + C_out * jnp.dtype(b.dtype).itemsize
        + N * C_out * HW * jnp.dtype(out_dtype).itemsize
    )

    out = pl.pallas_call(
        _outconv_kernel,
        out_shape=jax.ShapeDtypeStruct((N, C_out, HW), out_dtype),
        grid_spec=pltpu.PrefetchScalarGridSpec(
            num_scalar_prefetch=0,
            grid=grid,
            in_specs=[x_spec, w_spec, b_spec],
            out_specs=o_spec,
        ),
        compiler_params=pltpu.CompilerParams(
            dimension_semantics=dim_sem,
            vmem_limit_bytes=vmem_limit,
        ),
        cost_estimate=pl.CostEstimate(
            flops=flops, transcendentals=0, bytes_accessed=bytes_accessed
        ),
    )(x, w, b)

    # Free reshape back to NCHW — no slice, no pad, no extra HBM pass.
    return out.reshape(N, C_out, H, W)


if __name__ == "__main__":
    # Small shapes consistent with the module's forward.
    N, C_in, C_out, H, W = 2, 4, 3, 16, 16

    key = jax.random.PRNGKey(0)
    kx, kw, kb = jax.random.split(key, 3)

    x = jax.random.normal(kx, (N, C_in, H, W), dtype=jnp.float32)

    # Deterministic init mimicking PyTorch Conv2d default (uniform +/- 1/sqrt(fan_in)).
    bound = 1.0 / jnp.sqrt(jnp.float32(C_in * 1 * 1))
    weight = jax.random.uniform(kw, (C_out, C_in, 1, 1), jnp.float32, -bound, bound)
    bias = jax.random.uniform(kb, (C_out,), jnp.float32, -bound, bound)

    out = outconv_forward(x, weight, bias)
    out = jax.block_until_ready(out)

    # Pure-JAX reference check (1x1 conv == channel matmul + bias).
    ref = jnp.einsum("nchw,oc->nohw", x, weight.reshape(C_out, C_in)) + bias[None, :, None, None]
    assert out.shape == (N, C_out, H, W)
    assert jnp.allclose(out, ref, atol=1e-5, rtol=1e-5)

    print("KERNEL_OK")
</pallas_src>

<mosaic_0001>
module attributes {stable_mosaic.version = 11 : i64} {
  func.func @_outconv_kernel(%arg0: i32, %arg1: memref<2x4x256xf32, #tpu.memory_space<vmem>>, %arg2: memref<3x4xf32, #tpu.memory_space<vmem>>, %arg3: memref<3x1xf32, #tpu.memory_space<vmem>>, %arg4: memref<2x3x256xf32, #tpu.memory_space<vmem>>) attributes {dimension_semantics = [#tpu.dimension_semantics<parallel>], iteration_bounds = array<i64: 1>, scalar_prefetch = 0 : i64, scratch_operands = 0 : i64, tpu.core_type = #tpu.core_type<tc>, window_params = [{transform_indices = @transform_0, window_bounds = array<i64: 2, 4, 256>}, {pipeline_mode = #tpu.pipeline_mode<synchronous>, transform_indices = @transform_1, window_bounds = array<i64: 3, 4>}, {pipeline_mode = #tpu.pipeline_mode<synchronous>, transform_indices = @transform_2, window_bounds = array<i64: 3, 1>}, {transform_indices = @transform_3, window_bounds = array<i64: 2, 3, 256>}]} {
    %c0 = arith.constant 0 : index
    %c0_0 = arith.constant 0 : index
    %0 = vector.load %arg2[%c0, %c0_0] : memref<3x4xf32, #tpu.memory_space<vmem>>, vector<3x4xf32>
    %c0_1 = arith.constant 0 : index
    %c0_2 = arith.constant 0 : index
    %1 = vector.load %arg3[%c0_1, %c0_2] : memref<3x1xf32, #tpu.memory_space<vmem>>, vector<3x1xf32>
    %c0_3 = arith.constant 0 : index
    %c0_4 = arith.constant 0 : index
    %c0_5 = arith.constant 0 : index
    %2 = vector.load %arg1[%c0_3, %c0_4, %c0_5] : memref<2x4x256xf32, #tpu.memory_space<vmem>>, vector<1x4x256xf32>
    %3 = vector.shape_cast %2 : vector<1x4x256xf32> to vector<4x256xf32>
    %cst = arith.constant dense<0.000000e+00> : vector<3x256xf32>
    %4 = tpu.matmul %0, %3, %cst {dimension_numbers = #tpu.dot_dimension_numbers<[1], [0], [0], [1], [0, 0, 1, 1], [], []>} : vector<3x4xf32>, vector<4x256xf32>, vector<3x256xf32> -> vector<3x256xf32>
    %5 = vector.broadcast %1 : vector<3x1xf32> to vector<3x256xf32>
    %6 = arith.addf %4, %5 : vector<3x256xf32>
    %c0_6 = arith.constant 0 : index
    %c0_7 = arith.constant 0 : index
    %c0_8 = arith.constant 0 : index
    %7 = vector.load %arg4[%c0_6, %c0_7, %c0_8] : memref<2x3x256xf32, #tpu.memory_space<vmem>>, vector<1x3x256xf32>
    %8 = vector.shape_cast %7 : vector<1x3x256xf32> to vector<3x256xf32>
    %9 = vector.shape_cast %6 : vector<3x256xf32> to vector<1x3x256xf32>
    tpu.vector_store %arg4[%c0_6, %c0_7, %c0_8], %9 {strides = array<i32>} : memref<2x3x256xf32, #tpu.memory_space<vmem>>, vector<1x3x256xf32>,
    %c1 = arith.constant 1 : index
    %c0_9 = arith.constant 0 : index
    %c0_10 = arith.constant 0 : index
    %10 = vector.load %arg1[%c1, %c0_9, %c0_10] : memref<2x4x256xf32, #tpu.memory_space<vmem>>, vector<1x4x256xf32>
    %11 = vector.shape_cast %10 : vector<1x4x256xf32> to vector<4x256xf32>
    %cst_11 = arith.constant dense<0.000000e+00> : vector<3x256xf32>
    %12 = tpu.matmul %0, %11, %cst_11 {dimension_numbers = #tpu.dot_dimension_numbers<[1], [0], [0], [1], [0, 0, 1, 1], [], []>} : vector<3x4xf32>, vector<4x256xf32>, vector<3x256xf32> -> vector<3x256xf32>
    %13 = vector.broadcast %1 : vector<3x1xf32> to vector<3x256xf32>
    %14 = arith.addf %12, %13 : vector<3x256xf32>
    %c1_12 = arith.constant 1 : index
    %c0_13 = arith.constant 0 : index
    %c0_14 = arith.constant 0 : index
    %15 = vector.load %arg4[%c1_12, %c0_13, %c0_14] : memref<2x3x256xf32, #tpu.memory_space<vmem>>, vector<1x3x256xf32>
    %16 = vector.shape_cast %15 : vector<1x3x256xf32> to vector<3x256xf32>
    %17 = vector.shape_cast %14 : vector<3x256xf32> to vector<1x3x256xf32>
    tpu.vector_store %arg4[%c1_12, %c0_13, %c0_14], %17 {strides = array<i32>} : memref<2x3x256xf32, #tpu.memory_space<vmem>>, vector<1x3x256xf32>,
    return
  }
  func.func @transform_0(%arg0: i32) -> (i32, i32, i32) {
    %c0_i32 = arith.constant 0 : i32
    %c0_i32_0 = arith.constant 0 : i32
    %c0_i32_1 = arith.constant 0 : i32
    return %c0_i32, %c0_i32_0, %arg0 : i32, i32, i32
  }
  func.func @transform_1(%arg0: i32) -> (i32, i32) {
    %c0_i32 = arith.constant 0 : i32
    %c0_i32_0 = arith.constant 0 : i32
    %c0_i32_1 = arith.constant 0 : i32
    return %c0_i32, %c0_i32_0 : i32, i32
  }
  func.func @transform_2(%arg0: i32) -> (i32, i32) {
    %c0_i32 = arith.constant 0 : i32
    %c0_i32_0 = arith.constant 0 : i32
    %c0_i32_1 = arith.constant 0 : i32
    return %c0_i32, %c0_i32_0 : i32, i32
  }
  func.func @transform_3(%arg0: i32) -> (i32, i32, i32) {
    %c0_i32 = arith.constant 0 : i32
    %c0_i32_0 = arith.constant 0 : i32
    %c0_i32_1 = arith.constant 0 : i32
    return %c0_i32, %c0_i32_0, %arg0 : i32, i32, i32
  }
}

</mosaic_0001>

<bundles_post_ra>
// kernel: outconv_forward.1
= control target key start
LH: loop header
LB: loop body
LE: loop exit
PB: predicated region body
PF: predicated region fallthrough
CT: control target
= control target key end

     0   :  { %vm28_vm0 = vcmask 1043456   ;;  %v211_v2 = vmov 0.0   ;;  %v212_v5 = vmov 0   ;;  %vm24_vm1 = vcmask 31744   ;;  %s255_s0 = inlined_call_operand.vmem [shape: f32[2,4,256], index: 0, kind: input, shape index: {}]   ;;  %s256_s1 = inlined_call_operand.vmem [shape: f32[3,4], index: 1, kind: input, shape index: {}]   ;;  %s257_s2 = inlined_call_operand.vmem [shape: f32[3,1], index: 2, kind: input, shape index: {}]   ;;  %s258_s3 = inlined_call_operand.vmem [shape: f32[2,3,256], index: 3, kind: output, shape index: {}]  }
   0x1   :  { %v16_v0 = vld [vmem:[%s255_s0] sm:$0xff]  ;;  %v201_v1 = vld [vmem:[%s255_s0 + $0x8] sm:$0xff]  ;;  %97 = vmatprep.mubr.f32.mxu0 %v211_v2  ;;  %181 = vmatprep.mubr.f32.mxu1 %v211_v2 }
   0x2   :  { %v23_v3 = vcombine.high %v16_v0, %v16_v0  ;;  %v112_v4 = vcombine.high %v201_v1, %v201_v1  ;;  %208 = vset.pattern.permute.xlu0 %v212_v5  ;;  %v15_v6 = vld [vmem:[%s257_s2] sm:$0x7] }
   0x3   :  { %v14_v7 = vld [vmem:[%s256_s1] sm:$0x7]  ;;  %19 = vperm.xlu0 %208, %v15_v6  }
   0x4   :  { %198 = vmatprep.subr.msk.mxu0 %vm28_vm0, %v23_v3  ;;  %202 = vmatprep.subr.msk.mxu1 %vm28_vm0, %v112_v4 }
   0x5   :  { %199 = vmatpush1.msk.msra.mxu0 %vm28_vm0, %v16_v0  ;;  %203 = vmatpush1.msk.msra.mxu1 %vm28_vm0, %v201_v1 }
   0x6   :  { %200 = vmatmul.mubr.msk.f32.vlgmr.msra.gmra.mrb[0].mxu0 %vm24_vm1, %v14_v7  ;;  %204 = vmatmul.mubr.msk.f32.vlgmr.msra.gmra.mrb[0].mxu1 %vm24_vm1, %v14_v7 }
  0x82   :  { %v20_v8 = vpop.permute.xlu0 %19 }
  0xd9   :  { %v99_v9 = vpop.f32.mrb[0].mxu0  ;;  %v183_v10 = vpop.f32.mrb[0].mxu1 }
  0xda   :  { %v100_v11 = vadd.f32 %v99_v9, %v20_v8  ;;  %v184_v12 = vadd.f32 %v183_v10, %v20_v8  ;;  %v101_v13 = vpop.f32.mrb[1].mxu0  ;;  %v185_v14 = vpop.f32.mrb[1].mxu1 }
  0xdb   :  { %v102_v15 = vadd.f32 %v101_v13, %v20_v8  ;;  %v186_v16 = vadd.f32 %v185_v14, %v20_v8 }
  0xdd   :  { %v106_v17 = vcombine.low %v100_v11, %v102_v15  ;;  %v190_v18 = vcombine.low %v184_v12, %v186_v16 }
  0xdf   :  { %108 = vst [vmem:[%s258_s3] sm:$0x77] %v106_v17  ;;  %205 = vst [vmem:[%s258_s3 + $0x8] sm:$0x77] %v190_v18 }

</bundles_post_ra>
